<compile_context>
chip_gen: v6e
topology: v6e:2x2x1
jax: 0.10.0
libtpu: 0.0.40
codegen_flags: <defaults>
</compile_context>

<pallas_src>
import functools

import jax
import jax.numpy as jnp
from jax.experimental import pallas as pl
from jax.experimental.pallas import tpu as pltpu


def _mlp_kernel(x_ref, w1_ref, b1_ref, w2_ref, b2_ref, wo_ref, bo_ref, o_ref,
                *, num_hidden_units, mxu_dtype):
    # x_ref: [TB, D_in]  (batch on sublanes, exactly as stored in HBM -> no
    #                     wrapper transpose). w1: [H, D_in], b1: [H, 1].
    x = x_ref[...]
    if mxu_dtype is not None:
        x = x.astype(mxu_dtype)

    # h = W1 @ x^T : contract over D_in on both operands (trans-B matmul).
    # Result is [H, TB] -> batch on lanes for the rest of the kernel; any
    # operand relayout Mosaic needs rides the otherwise-idle XLU slot.
    h = jax.lax.dot_general(
        w1_ref[...], x, (((1,), (1,)), ((), ())),
        preferred_element_type=jnp.float32) + b1_ref[...]
    h = jnp.maximum(h, 0.0)  # relu, [H, TB]

    def hidden_layer(i, h):
        # w2_ref[i]: [H, H], b2_ref[i]: [H, 1]
        rhs = h.astype(mxu_dtype) if mxu_dtype is not None else h
        h = jnp.dot(w2_ref[i], rhs, preferred_element_type=jnp.float32) + b2_ref[i]
        return jnp.maximum(h, 0.0)

    if num_hidden_units <= 8:
        # Small fixed depth: static unroll gives the LLO scheduler full visibility.
        for i in range(num_hidden_units):
            h = hidden_layer(i, h)
    else:
        # Deep stacks: real loop bounds code size / vreg live ranges; unroll=2
        # lets layer i+1's weight loads overlap layer i's MXU pops.
        h = jax.lax.fori_loop(0, num_hidden_units, hidden_layer, h, unroll=2)

    # Output layer (1 column): VPU broadcast-mul + sublane reduce instead of a
    # lane-sparse 1-row MXU matmul. wo: [H, 1], bo: [1, 1] -> z: [1, TB] (lane-dense).
    z = jnp.sum(h * wo_ref[...], axis=0, keepdims=True) + bo_ref[...]

    # Sigmoid as exp + EUP approximate reciprocal (both on the EUP slot).
    o_ref[...] = pl.reciprocal(1.0 + jnp.exp(-z), approx=True)


def mlp_forward(x, w1, b1, w2s, b2s, wo, bo, *, num_hidden_units,
                batch_tile=4096, mxu_dtype=None):
    """x: [B, D_in] (batch-first, like PyTorch). Weights in PyTorch orientation:
    w1 = hidden1.weight [H, D_in], b1 = hidden1.bias[:, None] [H, 1],
    w2s = stacked hidden2 weights [L, H, H], b2s = [L, H, 1],
    wo = output.weight.T [H, 1], bo = output.bias [1, 1].
    Set mxu_dtype=jnp.bfloat16 to feed the MXU bf16 inputs (f32 accumulation kept).
    Returns [B, 1] float32."""
    B, d_in = x.shape
    hidden = w1.shape[0]
    L = w2s.shape[0]
    assert L == num_hidden_units and num_hidden_units >= 1

    # Optional bf16 MXU inputs (v6e/v7x; skip on v5e unless profiling shows MXU-bound).
    if mxu_dtype is not None:
        w1 = w1.astype(mxu_dtype)
        w2s = w2s.astype(mxu_dtype)

    params = (w1, b1, w2s, b2s, wo, bo)
    param_bytes = sum(int(p.size) * p.dtype.itemsize for p in params)
    # Resident-weights guard: v7x has only 64 MiB physical / 32 MiB default scoped VMEM.
    # TODO(synk): stream w2s (extra grid axis over L or manual make_async_copy) if this trips.
    assert param_bytes <= 24 * 1024 * 1024, \
        "stacked hidden2 weights too large to keep VMEM-resident; stream them instead"

    # --- batch tile sizing -------------------------------------------------
    assert batch_tile % 128 == 0, "batch tile must be lane-dense (multiple of 128)"
    # Keep >=2 tiles when possible so the ("parallel",) axis can shard across
    # v7x's two TensorCores; harmless one extra step on single-TC v5e/v6e.
    two_tile_cap = max(128, pl.cdiv(pl.cdiv(B, 2), 128) * 128)
    batch_tile = max(128, min(batch_tile, two_tile_cap))

    def step_bytes(tb):
        # Double-buffered x + out tiles, activation temporaries (headroom), resident params.
        return (2 * d_in * tb * 4 + 2 * tb * 4 + 4 * hidden * tb * 4 + param_bytes)

    # Shrink the tile if the per-step footprint would blow a conservative VMEM budget.
    while batch_tile > 128 and step_bytes(batch_tile) > 40 * 1024 * 1024:
        batch_tile -= 128

    num_tiles = pl.cdiv(B, batch_tile)
    b_pad = num_tiles * batch_tile

    # x is consumed batch-first straight from HBM (no transpose pass). Only pad
    # rows when the batch isn't tile-aligned; jnp.pad fuses into one pass.
    x_p = x if b_pad == B else jnp.pad(x, ((0, b_pad - B), (0, 0)))

    kernel = functools.partial(_mlp_kernel, num_hidden_units=num_hidden_units,
                               mxu_dtype=mxu_dtype)

    cp_kwargs = dict(dimension_semantics=("parallel",))
    # v5e's default scoped VMEM is only 16 MiB; raise it explicitly for big tiles.
    vmem_needed = step_bytes(batch_tile)
    if vmem_needed > 12 * 1024 * 1024:
        cp_kwargs["vmem_limit_bytes"] = int(min(vmem_needed + (8 << 20), 48 << 20))

    out = pl.pallas_call(
        kernel,
        out_shape=jax.ShapeDtypeStruct((1, b_pad), jnp.float32),
        grid=(num_tiles,),
        in_specs=[
            # Batch-tiled activations, batch on sublanes as stored.
            # (Tuning knob: add pipeline_mode=pl.Buffered(3) here if profiling
            #  ever shows exposed x DMA at the chosen tile size.)
            pl.BlockSpec((batch_tile, d_in), lambda i: (i, 0)),
            # Grid-invariant (VMEM-resident) parameters.
            pl.BlockSpec(w1.shape, lambda i: (0, 0)),
            pl.BlockSpec(b1.shape, lambda i: (0, 0)),
            pl.BlockSpec(w2s.shape, lambda i: (0, 0, 0)),
            pl.BlockSpec(b2s.shape, lambda i: (0, 0, 0)),
            pl.BlockSpec(wo.shape, lambda i: (0, 0)),
            pl.BlockSpec(bo.shape, lambda i: (0, 0)),
        ],
        out_specs=pl.BlockSpec((1, batch_tile), lambda i: (0, i)),  # lane-dense output
        compiler_params=pltpu.CompilerParams(**cp_kwargs),
    )(x_p, w1, b1, w2s, b2s, wo, bo)

    # Back to PyTorch's [B, 1] batch-first convention; drop the pad columns.
    return out[0, :B][:, None]


if __name__ == "__main__":
    # Module hyper-parameters (small, consistent with the PyTorch __init__).
    input_dim = 15
    hidden_size = 32
    num_hidden_units = 2
    batch = 8

    key = jax.random.PRNGKey(0)
    k_x, k_w1, k_b1, k_w2, k_b2, k_wo, k_bo = jax.random.split(key, 7)

    x = jax.random.normal(k_x, (batch, input_dim), dtype=jnp.float32)

    def uniform(k, shape, fan_in):
        bound = 1.0 / jnp.sqrt(jnp.float32(fan_in))
        return jax.random.uniform(k, shape, jnp.float32, -bound, bound)

    # Parameters in PyTorch Linear orientation ([out_features, in_features]).
    w1 = uniform(k_w1, (hidden_size, input_dim), input_dim)                   # hidden1.weight
    b1 = uniform(k_b1, (hidden_size, 1), input_dim)                           # hidden1.bias
    w2s = uniform(k_w2, (num_hidden_units, hidden_size, hidden_size), hidden_size)
    b2s = uniform(k_b2, (num_hidden_units, hidden_size, 1), hidden_size)
    wo = uniform(k_wo, (hidden_size, 1), hidden_size)                         # output.weight.T
    bo = uniform(k_bo, (1, 1), hidden_size)                                   # output.bias

    out = mlp_forward(x, w1, b1, w2s, b2s, wo, bo,
                      num_hidden_units=num_hidden_units)
    out = jax.block_until_ready(out)

    # Pure-JAX reference (batch-first, PyTorch convention y = x @ W.T + b).
    h = jnp.maximum(x @ w1.T + b1[:, 0], 0.0)
    for i in range(num_hidden_units):
        h = jnp.maximum(h @ w2s[i].T + b2s[i][:, 0], 0.0)
    ref = jax.nn.sigmoid(h @ wo + bo[0])

    assert out.shape == (batch, 1)
    # Tolerance relaxed slightly because the kernel uses the EUP approximate
    # reciprocal for the sigmoid (outputs are in (0, 1), so this is generous).
    assert jnp.allclose(out, ref, atol=2e-3, rtol=2e-3), float(jnp.max(jnp.abs(out - ref)))

    print("KERNEL_OK")
</pallas_src>

<mosaic_0001>
module attributes {stable_mosaic.version = 11 : i64} {
  func.func @_mlp_kernel(%arg0: i32, %arg1: memref<128x15xf32, #tpu.memory_space<vmem>>, %arg2: memref<32x15xf32, #tpu.memory_space<vmem>>, %arg3: memref<32x1xf32, #tpu.memory_space<vmem>>, %arg4: memref<2x32x32xf32, #tpu.memory_space<vmem>>, %arg5: memref<2x32x1xf32, #tpu.memory_space<vmem>>, %arg6: memref<32x1xf32, #tpu.memory_space<vmem>>, %arg7: memref<1x1xf32, #tpu.memory_space<vmem>>, %arg8: memref<1x128xf32, #tpu.memory_space<vmem>>) attributes {dimension_semantics = [#tpu.dimension_semantics<parallel>], iteration_bounds = array<i64: 1>, scalar_prefetch = 0 : i64, scratch_operands = 0 : i64, tpu.core_type = #tpu.core_type<tc>, window_params = [{transform_indices = @transform_0, window_bounds = array<i64: 128, 15>}, {pipeline_mode = #tpu.pipeline_mode<synchronous>, transform_indices = @transform_1, window_bounds = array<i64: 32, 15>}, {pipeline_mode = #tpu.pipeline_mode<synchronous>, transform_indices = @transform_2, window_bounds = array<i64: 32, 1>}, {pipeline_mode = #tpu.pipeline_mode<synchronous>, transform_indices = @transform_3, window_bounds = array<i64: 2, 32, 32>}, {pipeline_mode = #tpu.pipeline_mode<synchronous>, transform_indices = @transform_4, window_bounds = array<i64: 2, 32, 1>}, {pipeline_mode = #tpu.pipeline_mode<synchronous>, transform_indices = @transform_5, window_bounds = array<i64: 32, 1>}, {pipeline_mode = #tpu.pipeline_mode<synchronous>, transform_indices = @transform_6, window_bounds = array<i64: 1, 1>}, {transform_indices = @transform_7, window_bounds = array<i64: 1, 128>}]} {
    %c0 = arith.constant 0 : index
    %c0_0 = arith.constant 0 : index
    %0 = vector.load %arg1[%c0, %c0_0] : memref<128x15xf32, #tpu.memory_space<vmem>>, vector<128x15xf32>
    %c0_1 = arith.constant 0 : index
    %c0_2 = arith.constant 0 : index
    %1 = vector.load %arg2[%c0_1, %c0_2] : memref<32x15xf32, #tpu.memory_space<vmem>>, vector<32x15xf32>
    %cst = arith.constant dense<0.000000e+00> : vector<32x128xf32>
    %2 = tpu.matmul %1, %0, %cst {dimension_numbers = #tpu.dot_dimension_numbers<[1], [1], [0], [0], [0, 0, 1, 0], [], []>} : vector<32x15xf32>, vector<128x15xf32>, vector<32x128xf32> -> vector<32x128xf32>
    %c0_3 = arith.constant 0 : index
    %c0_4 = arith.constant 0 : index
    %3 = vector.load %arg3[%c0_3, %c0_4] : memref<32x1xf32, #tpu.memory_space<vmem>>, vector<32x1xf32>
    %4 = vector.broadcast %3 : vector<32x1xf32> to vector<32x128xf32>
    %5 = arith.addf %2, %4 : vector<32x128xf32>
    %cst_5 = arith.constant 0.000000e+00 : f32
    %6 = vector.broadcast %cst_5 : f32 to vector<32x128xf32>
    %7 = arith.maximumf %5, %6 : vector<32x128xf32>
    %c0_6 = arith.constant 0 : index
    %c0_7 = arith.constant 0 : index
    %c0_8 = arith.constant 0 : index
    %8 = vector.load %arg4[%c0_6, %c0_7, %c0_8] : memref<2x32x32xf32, #tpu.memory_space<vmem>>, vector<1x32x32xf32>
    %9 = vector.shape_cast %8 : vector<1x32x32xf32> to vector<32x32xf32>
    %cst_9 = arith.constant dense<0.000000e+00> : vector<32x128xf32>
    %10 = tpu.matmul %9, %7, %cst_9 {dimension_numbers = #tpu.dot_dimension_numbers<[1], [0], [0], [1], [0, 0, 1, 1], [], []>} : vector<32x32xf32>, vector<32x128xf32>, vector<32x128xf32> -> vector<32x128xf32>
    %c0_10 = arith.constant 0 : index
    %c0_11 = arith.constant 0 : index
    %c0_12 = arith.constant 0 : index
    %11 = vector.load %arg5[%c0_10, %c0_11, %c0_12] : memref<2x32x1xf32, #tpu.memory_space<vmem>>, vector<1x32x1xf32>
    %12 = vector.shape_cast %11 : vector<1x32x1xf32> to vector<32x1xf32>
    %13 = vector.broadcast %12 : vector<32x1xf32> to vector<32x128xf32>
    %14 = arith.addf %10, %13 : vector<32x128xf32>
    %cst_13 = arith.constant 0.000000e+00 : f32
    %15 = vector.broadcast %cst_13 : f32 to vector<32x128xf32>
    %16 = arith.maximumf %14, %15 : vector<32x128xf32>
    %c1 = arith.constant 1 : index
    %c0_14 = arith.constant 0 : index
    %c0_15 = arith.constant 0 : index
    %17 = vector.load %arg4[%c1, %c0_14, %c0_15] : memref<2x32x32xf32, #tpu.memory_space<vmem>>, vector<1x32x32xf32>
    %18 = vector.shape_cast %17 : vector<1x32x32xf32> to vector<32x32xf32>
    %cst_16 = arith.constant dense<0.000000e+00> : vector<32x128xf32>
    %19 = tpu.matmul %18, %16, %cst_16 {dimension_numbers = #tpu.dot_dimension_numbers<[1], [0], [0], [1], [0, 0, 1, 1], [], []>} : vector<32x32xf32>, vector<32x128xf32>, vector<32x128xf32> -> vector<32x128xf32>
    %c1_17 = arith.constant 1 : index
    %c0_18 = arith.constant 0 : index
    %c0_19 = arith.constant 0 : index
    %20 = vector.load %arg5[%c1_17, %c0_18, %c0_19] : memref<2x32x1xf32, #tpu.memory_space<vmem>>, vector<1x32x1xf32>
    %21 = vector.shape_cast %20 : vector<1x32x1xf32> to vector<32x1xf32>
    %22 = vector.broadcast %21 : vector<32x1xf32> to vector<32x128xf32>
    %23 = arith.addf %19, %22 : vector<32x128xf32>
    %cst_20 = arith.constant 0.000000e+00 : f32
    %24 = vector.broadcast %cst_20 : f32 to vector<32x128xf32>
    %25 = arith.maximumf %23, %24 : vector<32x128xf32>
    %c0_21 = arith.constant 0 : index
    %c0_22 = arith.constant 0 : index
    %26 = vector.load %arg6[%c0_21, %c0_22] : memref<32x1xf32, #tpu.memory_space<vmem>>, vector<32x1xf32>
    %27 = vector.broadcast %26 : vector<32x1xf32> to vector<32x128xf32>
    %28 = arith.mulf %25, %27 : vector<32x128xf32>
    %cst_23 = arith.constant dense<0.000000e+00> : vector<128xf32>
    %29 = vector.multi_reduction <add>, %28, %cst_23 [0] : vector<32x128xf32> to vector<128xf32>
    %30 = vector.shape_cast %29 : vector<128xf32> to vector<1x128xf32>
    %c0_24 = arith.constant 0 : index
    %c0_25 = arith.constant 0 : index
    %31 = vector.load %arg7[%c0_24, %c0_25] : memref<1x1xf32, #tpu.memory_space<vmem>>, vector<1x1xf32>
    %32 = vector.broadcast %31 : vector<1x1xf32> to vector<1x128xf32>
    %33 = arith.addf %30, %32 : vector<1x128xf32>
    %cst_26 = arith.constant 0.000000e+00 : f32
    %34 = vector.broadcast %cst_26 : f32 to vector<1x128xf32>
    %35 = arith.subf %34, %33 : vector<1x128xf32>
    %36 = math.exp %35 : vector<1x128xf32>
    %cst_27 = arith.constant 1.000000e+00 : f32
    %37 = vector.broadcast %cst_27 : f32 to vector<1x128xf32>
    %38 = arith.addf %37, %36 : vector<1x128xf32>
    %39 = tpu.reciprocal %38 {approx = true} : vector<1x128xf32> -> vector<1x128xf32>
    %c0_28 = arith.constant 0 : index
    %c0_29 = arith.constant 0 : index
    %40 = vector.load %arg8[%c0_28, %c0_29] : memref<1x128xf32, #tpu.memory_space<vmem>>, vector<1x128xf32>
    tpu.vector_store %arg8[%c0_28, %c0_29], %39 {strides = array<i32>} : memref<1x128xf32, #tpu.memory_space<vmem>>, vector<1x128xf32>,
    return
  }
  func.func @transform_0(%arg0: i32) -> (i32, i32) {
    %c0_i32 = arith.constant 0 : i32
    %c0_i32_0 = arith.constant 0 : i32
    return %arg0, %c0_i32 : i32, i32
  }
  func.func @transform_1(%arg0: i32) -> (i32, i32) {
    %c0_i32 = arith.constant 0 : i32
    %c0_i32_0 = arith.constant 0 : i32
    %c0_i32_1 = arith.constant 0 : i32
    return %c0_i32, %c0_i32_0 : i32, i32
  }
  func.func @transform_2(%arg0: i32) -> (i32, i32) {
    %c0_i32 = arith.constant 0 : i32
    %c0_i32_0 = arith.constant 0 : i32
    %c0_i32_1 = arith.constant 0 : i32
    return %c0_i32, %c0_i32_0 : i32, i32
  }
  func.func @transform_3(%arg0: i32) -> (i32, i32, i32) {
    %c0_i32 = arith.constant 0 : i32
    %c0_i32_0 = arith.constant 0 : i32
    %c0_i32_1 = arith.constant 0 : i32
    %c0_i32_2 = arith.constant 0 : i32
    return %c0_i32, %c0_i32_0, %c0_i32_1 : i32, i32, i32
  }
  func.func @transform_4(%arg0: i32) -> (i32, i32, i32) {
    %c0_i32 = arith.constant 0 : i32
    %c0_i32_0 = arith.constant 0 : i32
    %c0_i32_1 = arith.constant 0 : i32
    %c0_i32_2 = arith.constant 0 : i32
    return %c0_i32, %c0_i32_0, %c0_i32_1 : i32, i32, i32
  }
  func.func @transform_5(%arg0: i32) -> (i32, i32) {
    %c0_i32 = arith.constant 0 : i32
    %c0_i32_0 = arith.constant 0 : i32
    %c0_i32_1 = arith.constant 0 : i32
    return %c0_i32, %c0_i32_0 : i32, i32
  }
  func.func @transform_6(%arg0: i32) -> (i32, i32) {
    %c0_i32 = arith.constant 0 : i32
    %c0_i32_0 = arith.constant 0 : i32
    %c0_i32_1 = arith.constant 0 : i32
    return %c0_i32, %c0_i32_0 : i32, i32
  }
  func.func @transform_7(%arg0: i32) -> (i32, i32) {
    %c0_i32 = arith.constant 0 : i32
    %c0_i32_0 = arith.constant 0 : i32
    return %c0_i32, %arg0 : i32, i32
  }
}

</mosaic_0001>

<bundles_post_ra>
// kernel: tpu_custom_call.1
= control target key start
LH: loop header
LB: loop body
LE: loop exit
PB: predicated region body
PF: predicated region fallthrough
CT: control target
= control target key end

     0   :  { %s944_s0 = inlined_call_operand.vmem [shape: f32[128,15], index: 0, kind: input, shape index: {}]   ;;  %s945_s1 = inlined_call_operand.vmem [shape: f32[32,15], index: 1, kind: input, shape index: {}]   ;;  %s946_s2 = inlined_call_operand.vmem [shape: f32[32,1], index: 2, kind: input, shape index: {}]   ;;  %s947_s3 = inlined_call_operand.vmem [shape: f32[2,32,32], index: 3, kind: input, shape index: {}]   ;;  %s948_s4 = inlined_call_operand.vmem [shape: f32[2,32,1], index: 4, kind: input, shape index: {}]   ;;  %s949_s5 = inlined_call_operand.vmem [shape: f32[32,1], index: 5, kind: input, shape index: {}]   ;;  %s950_s6 = inlined_call_operand.<no memory space> [shape: f32[1,1], index: 6, kind: input, shape index: {}]   ;;  %s951_s7 = inlined_call_operand.hbm [shape: f32[1,128], index: 7, kind: output, shape index: {}]  }
   0x1   :  { %v12_v0 = vstv %s950_s6 }
   0x2   :  { %13 = vst [vmem:[#allocation2] sm:$0x1] %v12_v0 }
   0x3   :  { %v44_v1 = vld [vmem:[%s944_s0 + $0x78] sm:$0xff]  ;;  %vm73_vm0 = vcmask 121856   ;;  %v43_v2 = vld [vmem:[%s944_s0 + $0x70] sm:$0xff]  ;;  %v720_v3 = vmov 0   ;;  %v42_v4 = vld [vmem:[%s944_s0 + $0x68] sm:$0xff] }
   0x4   :  { %624 = vmatprep.subr.msk.mxu0 %vm73_vm0, %v44_v1  ;;  %692 = vset.pattern.permute.xlu0 %v720_v3  ;;  %v45_v5 = vld [vmem:[%s945_s1] sm:$0xff]  ;;  %v52_v6 = vld [vmem:[%s946_s2 + $0x18] sm:$0xff]  ;;  %v50_v7 = vld [vmem:[%s946_s2 + $0x8] sm:$0xff] }
   0x5   :  { %625 = vmatpush3.xpose.msk.msra.mxu0 %vm73_vm0, %v44_v1  ;;  %693 = vset.pattern.permute.xlu1 %v720_v3  ;;  %v41_v8 = vld [vmem:[%s944_s0 + $0x60] sm:$0xff]  ;;  %v51_v9 = vld [vmem:[%s946_s2 + $0x10] sm:$0xff]  ;;  %v40_v11 = vld [vmem:[%s944_s0 + $0x58] sm:$0xff] }
   0x6   :  { %626 = vmatprep.subr.msk.mxu0 %vm73_vm0, %v43_v2  ;;  %656 = vmatprep.mubr.msk.f32.mxu0 %vm73_vm0, %v45_v5  ;;  %v49_v10 = vld [vmem:[%s946_s2] sm:$0xff]  ;;  %v230_v12 = vld [vmem:[%s948_s4 + $0x18] sm:$0xff] }
   0x7   :  { %70 = vperm.xlu0 %692, %v52_v6   ;;  %60 = vperm.xlu1 %693, %v50_v7  }
   0x9   :  { %627 = vmatpush3.xpose.msk.msra.mxu0 %vm73_vm0, %v43_v2 }
   0xa   :  { %628 = vmatprep.subr.msk.mxu0 %vm73_vm0, %v42_v4 }
   0xb   :  { %65 = vperm.xlu0 %692, %v51_v9   ;;  %55 = vperm.xlu1 %693, %v49_v10  }
   0xd   :  { %629 = vmatpush3.xpose.msk.msra.mxu0 %vm73_vm0, %v42_v4 }
   0xe   :  { %630 = vmatprep.subr.msk.mxu0 %vm73_vm0, %v41_v8 }
   0xf   :  { %14 = vsyncpa [#allocation4], 0  ;;  %v229_v13 = vld [vmem:[%s948_s4 + $0x10] sm:$0xff]  ;;  %248 = vperm.xlu0 %692, %v230_v12   ;;  %v228_v15 = vld [vmem:[%s948_s4 + $0x8] sm:$0xff]  ;;  %vm251_vm1 = vcmask 261120  }
  0x10   :  { %v39_v14 = vld [vmem:[%s944_s0 + $0x50] sm:$0xff]  ;;  %243 = vperm.xlu1 %693, %v229_v13   ;;  %v227_v16 = vld [vmem:[%s948_s4] sm:$0xff]  ;;  %v38_v17 = vld [vmem:[%s944_s0 + $0x48] sm:$0xff] }
  0x11   :  { %631 = vmatpush3.xpose.msk.msra.mxu0 %vm73_vm0, %v41_v8  ;;  %v580_v18 = vld [vmem:[%s948_s4 + $0x20] sm:$0xff]  ;;  %v581_v19 = vld [vmem:[%s948_s4 + $0x28] sm:$0xff]  ;;  %v582_v21 = vld [vmem:[%s948_s4 + $0x30] sm:$0xff] }
  0x12   :  { %632 = vmatprep.subr.msk.mxu0 %vm73_vm0, %v40_v11  ;;  %v37_v20 = vld [vmem:[%s944_s0 + $0x40] sm:$0xff]  ;;  %v583_v22 = vld [vmem:[%s948_s4 + $0x38] sm:$0xff]  ;;  %v485_v25 = vld [vmem:[%s949_s5 + $0x8] sm:$0xff] }
  0x13   :  { %238 = vperm.xlu0 %692, %v228_v15   ;;  %v36_v23 = vld [vmem:[%s944_s0 + $0x38] sm:$0xff]  ;;  %v484_v24 = vld [vmem:[%s949_s5] sm:$0xff]  ;;  %v35_v26 = vld [vmem:[%s944_s0 + $0x30] sm:$0xff] }
  0x14   :  { %233 = vperm.xlu1 %693, %v227_v16   ;;  %v486_v27 = vld [vmem:[%s949_s5 + $0x10] sm:$0xff]  ;;  %v487_v28 = vld [vmem:[%s949_s5 + $0x18] sm:$0xff]  ;;  %v34_v29 = vld [vmem:[%s944_s0 + $0x28] sm:$0xff] }
  0x15   :  { %633 = vmatpush3.xpose.msk.msra.mxu0 %vm73_vm0, %v40_v11  ;;  %v521_v30 = vld [vmem:[#allocation2] sm:$0x1]  ;;  %v32_v32 = vld [vmem:[%s944_s0 + $0x18] sm:$0xff]  ;;  %v31_v33 = vld [vmem:[%s944_s0 + $0x10] sm:$0xff] }
  0x16   :  { %634 = vmatprep.subr.msk.mxu0 %vm73_vm0, %v39_v14  ;;  %v33_v31 = vld [vmem:[%s944_s0 + $0x20] sm:$0xff]  ;;  %v30_v34 = vld [vmem:[%s944_s0 + $0x8] sm:$0xff]  ;;  %v47_v37 = vld [vmem:[%s945_s1 + $0x10] sm:$0xff] }
  0x17   :  { %365 = vperm.xlu0 %692, %v580_v18   ;;  %v29_v35 = vld [vmem:[%s944_s0] sm:$0xff]  ;;  %v46_v36 = vld [vmem:[%s945_s1 + $0x8] sm:$0xff]  ;;  %v48_v38 = vld [vmem:[%s945_s1 + $0x18] sm:$0xff] }
  0x18   :  { %370 = vperm.xlu1 %693, %v581_v19   ;;  %v223_v39 = vld [vmem:[%s947_s3] sm:$0xff]  ;;  %v224_v56 = vld [vmem:[%s947_s3 + $0x8] sm:$0xff]  ;;  %v225_v57 = vld [vmem:[%s947_s3 + $0x10] sm:$0xff] }
  0x19   :  { %635 = vmatpush3.xpose.msk.msra.mxu0 %vm73_vm0, %v39_v14  ;;  %670 = vmatprep.mubr.msk.f32.mxu1 %vm251_vm1, %v223_v39  ;;  %v226_v58 = vld [vmem:[%s947_s3 + $0x18] sm:$0xff]  ;;  %v576_v59 = vld [vmem:[%s947_s3 + $0x20] sm:$0xff]  ;;  %v577_v12 = vld [vmem:[%s947_s3 + $0x28] sm:$0xff] }
  0x1a   :  { %636 = vmatprep.subr.msk.mxu0 %vm73_vm0, %v38_v17  ;;  %v578_v13 = vld [vmem:[%s947_s3 + $0x30] sm:$0xff]  ;;  %v579_v14 = vld [vmem:[%s947_s3 + $0x38] sm:$0xff]  ;;  %s721_s3 = smov [#allocation3]  }
  0x1b   :  { %375 = vperm.xlu0 %692, %v582_v21   ;;  %s544_s9 = sshll.u32 %s721_s3, 4  ;;  %s545_s9 = int_to_ptr.vmem [resolvable:$true] %s544_s9 }
  0x1c   :  { %380 = vperm.xlu1 %693, %v583_v22   ;;  %s698_s10 = scalar_lea.vmem %s545_s9, 16  ;;  %s702_s11 = scalar_lea.vmem %s545_s9, 32 }
  0x1d   :  { %637 = vmatpush3.xpose.msk.msra.mxu0 %vm73_vm0, %v38_v17  ;;  %p699_p0 = scmp.ne.s32.totalorder %s545_s9, %s698_s10  ;;  %p703_p1 = scmp.lt.s32.totalorder %s545_s9, %s545_s9 }
  0x1e   :  { %638 = vmatprep.subr.msk.mxu0 %vm73_vm0, %v37_v20  ;;  %p704_p2 = scmp.lt.s32.totalorder %s702_s11, %s698_s10 }
  0x1f   :  { %490 = vperm.xlu0 %692, %v484_v24  }
  0x20   :  { %495 = vperm.xlu1 %693, %v485_v25   ;;  %p705_p3 = por %p704_p2, %p703_p1 }
  0x21   :  { %639 = vmatpush3.xpose.msk.msra.mxu0 %vm73_vm0, %v37_v20 }
  0x22   :  { %640 = vmatprep.subr.msk.mxu0 %vm73_vm0, %v36_v23  ;;  %p706_p4 = pnand %p705_p3, %p699_p0 }
  0x23   :  { %500 = vperm.xlu0 %692, %v486_v27  }
  0x24   :  { %505 = vperm.xlu1 %693, %v487_v28  }
  0x25   :  { %641 = vmatpush3.xpose.msk.msra.mxu0 %vm73_vm0, %v36_v23 }
  0x26   :  { %642 = vmatprep.subr.msk.mxu0 %vm73_vm0, %v35_v26 }
  0x27   :  { %524 = vperm.xlu0 %692, %v521_v30  }
  0x29   :  { %643 = vmatpush3.xpose.msk.msra.mxu0 %vm73_vm0, %v35_v26 }
  0x2a   :  { %644 = vmatprep.subr.msk.mxu0 %vm73_vm0, %v34_v29 }
  0x2d   :  { %645 = vmatpush3.xpose.msk.msra.mxu0 %vm73_vm0, %v34_v29 }
  0x2e   :  { %646 = vmatprep.subr.msk.mxu0 %vm73_vm0, %v33_v31 }
  0x31   :  { %647 = vmatpush3.xpose.msk.msra.mxu0 %vm73_vm0, %v33_v31 }
  0x32   :  { %648 = vmatprep.subr.msk.mxu0 %vm73_vm0, %v32_v32 }
  0x35   :  { %649 = vmatpush3.xpose.msk.msra.mxu0 %vm73_vm0, %v32_v32 }
  0x36   :  { %650 = vmatprep.subr.msk.mxu0 %vm73_vm0, %v31_v33 }
  0x39   :  { %651 = vmatpush3.xpose.msk.msra.mxu0 %vm73_vm0, %v31_v33 }
  0x3a   :  { %652 = vmatprep.subr.msk.mxu0 %vm73_vm0, %v30_v34 }
  0x3d   :  { %653 = vmatpush3.xpose.msk.msra.mxu0 %vm73_vm0, %v30_v34 }
  0x3e   :  { %654 = vmatprep.subr.msk.mxu0 %vm73_vm0, %v29_v35 }
  0x41   :  { %655 = vmatpush3.xpose.msk.msra.mxu0 %vm73_vm0, %v29_v35 }
  0x44   :  { %657 = vmatmul.mubr.msk.f32.vlgmr.msra.gmra.mxu0 %vm73_vm0, %v46_v36 }
  0x45   :  { %659 = vmatprep.mubr.msk.f32.mxu0 %vm73_vm0, %v47_v37 }
  0x48   :  { %660 = vmatmul.mubr.msk.f32.gmra.mxu0 %vm73_vm0, %v48_v38 }
  0x82   :  { %v71_v40 = vpop.permute.xlu0 %70  ;;  %v61_v42 = vpop.permute.xlu1 %60 }
  0x86   :  { %v66_v46 = vpop.permute.xlu0 %65  ;;  %v56_v51 = vpop.permute.xlu1 %55 }
  0x8a   :  { %v249_v60 = vpop.permute.xlu0 %248 }
  0x8b   :  { %v244_v62 = vpop.permute.xlu1 %243 }
  0x8e   :  { %v239_v2 = vpop.permute.xlu0 %238 }
  0x8f   :  { %v234_v7 = vpop.permute.xlu1 %233 }
  0x92   :  { %v366_v15 = vpop.permute.xlu0 %365 }
  0x93   :  { %v371_v16 = vpop.permute.xlu1 %370 }
  0x96   :  { %v376_v17 = vpop.permute.xlu0 %375 }
  0x97   :  { %v381_v18 = vpop.permute.xlu1 %380 }
  0x9a   :  { %v491_v23 = vpop.permute.xlu0 %490 }
  0x9b   :  { %v496_v28 = vpop.permute.xlu1 %495 }
  0x9e   :  { %v501_v35 = vpop.permute.xlu0 %500 }
  0x9f   :  { %v506_v38 = vpop.permute.xlu1 %505 }
 0x104   :  { %v658_v41 = vpop.f32.mrf.mxu0 }
 0x105   :  { %v206_v48 = vadd.f32 %v658_v41, %v61_v42  ;;  %v527_v41 = vlaneseq }
 0x106   :  { %v200_v43 = vpop.f32.mrf.mxu0 }
 0x107   :  { %v201_v52 = vadd.f32 %v200_v43, %v56_v51  ;;  %v220_v54 = vmax.f32 %v206_v48, 0.0 }
 0x108   :  { %v661_v44 = vpop.f32.mrf.mxu0 }
 0x109   :  { %v216_v45 = vadd.f32 %v661_v44, %v71_v40  ;;  %v219_v55 = vmax.f32 %v201_v52, 0.0  ;;  %v528_v44 = vshrl.u32 %v527_v41, 7 }
 0x10a   :  { %v210_v47 = vpop.f32.mrf.mxu0 }
 0x10b   :  { %v222_v49 = vmax.f32 %v216_v45, 0.0  ;;  %v211_v50 = vadd.f32 %v210_v47, %v66_v46  ;;  %v529_v47 = vsub.s32 0, %v528_v44 }
 0x10d   :  { %v221_v53 = vmax.f32 %v211_v50, 0.0  ;;  %662 = vmatprep.subr.mxu1 %v222_v49 }
 0x10e   :  { %663 = vmatpush3.msra.mxu1 %v222_v49  ;;  %v525_v49 = vpop.permute.xlu0 %524 }
 0x10f   :  { %664 = vmatprep.subr.mxu1 %v221_v53  ;;  %v530_v51 = vrot.slane %v525_v49, %v529_v47 }
 0x110   :  { %665 = vmatpush3.msra.mxu1 %v221_v53 }
 0x111   :  { %666 = vmatprep.subr.mxu1 %v220_v54 }
 0x112   :  { %667 = vmatpush3.msra.mxu1 %v220_v54 }
 0x113   :  { %668 = vmatprep.subr.mxu1 %v219_v55 }
 0x114   :  { %669 = vmatpush3.msra.mxu1 %v219_v55 }
 0x115   :  { %671 = vmatmul.mubr.msk.f32.vlgmr.msra.gmra.mxu1 %vm251_vm1, %v224_v56 }
 0x116   :  { %673 = vmatprep.mubr.msk.f32.mxu1 %vm251_vm1, %v225_v57 }
 0x119   :  { %674 = vmatmul.mubr.msk.f32.gmra.mxu1 %vm251_vm1, %v226_v58 }
 0x11a   :  { %684 = vmatprep.mubr.msk.f32.mxu1 %vm251_vm1, %v576_v59 }
 0x1d5   :  { %v672_v61 = vpop.f32.mrf.mxu1 }
 0x1d6   :  { %v336_v4 = vadd.f32 %v672_v61, %v239_v2 }
 0x1d7   :  { %v330_v63 = vpop.f32.mrf.mxu1 }
 0x1d8   :  { %v331_v8 = vadd.f32 %v330_v63, %v234_v7  ;;  %v350_v10 = vmax.f32 %v336_v4, 0.0 }
 0x1d9   :  { %v675_v0 = vpop.f32.mrf.mxu1 }
 0x1da   :  { %v346_v1 = vadd.f32 %v675_v0, %v249_v60  ;;  %v349_v11 = vmax.f32 %v331_v8, 0.0 }
 0x1db   :  { %v340_v3 = vpop.f32.mrf.mxu1 }
 0x1dc   :  { %v352_v5 = vmax.f32 %v346_v1, 0.0  ;;  %v341_v6 = vadd.f32 %v340_v3, %v244_v62 }
 0x1de   :  { %v351_v9 = vmax.f32 %v341_v6, 0.0  ;;  %676 = vmatprep.subr.mxu1 %v352_v5 }
 0x1df   :  { %677 = vmatpush3.msra.mxu1 %v352_v5 }
 0x1e0   :  { %678 = vmatprep.subr.mxu1 %v351_v9 }
 0x1e1   :  { %679 = vmatpush3.msra.mxu1 %v351_v9 }
 0x1e2   :  { %680 = vmatprep.subr.mxu1 %v350_v10 }
 0x1e3   :  { %681 = vmatpush3.msra.mxu1 %v350_v10 }
 0x1e4   :  { %682 = vmatprep.subr.mxu1 %v349_v11 }
 0x1e5   :  { %683 = vmatpush3.msra.mxu1 %v349_v11 }
 0x1e6   :  { %685 = vmatmul.mubr.msk.f32.vlgmr.msra.gmra.mxu1 %vm251_vm1, %v577_v12 }
 0x1e7   :  { %687 = vmatprep.mubr.msk.f32.mxu1 %vm251_vm1, %v578_v13 }
 0x1ea   :  { %688 = vmatmul.mubr.msk.f32.gmra.mxu1 %vm251_vm1, %v579_v14 }
 0x2a6   :  { %v686_v19 = vpop.f32.mrf.mxu1 }
 0x2a7   :  { %v467_v20 = vadd.f32 %v686_v19, %v371_v16 }
 0x2a8   :  { %v461_v21 = vpop.f32.mrf.mxu1 }
 0x2a9   :  { %v462_v22 = vadd.f32 %v461_v21, %v366_v15  ;;  %v481_v25 = vmax.f32 %v467_v20, 0.0 }
 0x2aa   :  { %v689_v24 = vpop.f32.mrf.mxu1 }
 0x2ab   :  { %v480_v26 = vmax.f32 %v462_v22, 0.0  ;;  %v477_v27 = vadd.f32 %v689_v24, %v381_v18  ;;  %v509_v32 = vmul.f32 %v496_v28, %v481_v25 }
 0x2ac   :  { %v471_v29 = vpop.f32.mrf.mxu1 }
 0x2ad   :  { %v508_v30 = vmul.f32 %v491_v23, %v480_v26  ;;  %v472_v31 = vadd.f32 %v471_v29, %v376_v17  ;;  %v483_v33 = vmax.f32 %v477_v27, 0.0 }
 0x2af   :  { %v482_v34 = vmax.f32 %v472_v31, 0.0  ;;  %v512_v36 = vadd.f32 %v509_v32, %v508_v30  ;;  %v511_v39 = vmul.f32 %v506_v38, %v483_v33 }
 0x2b1   :  { %v510_v37 = vmul.f32 %v501_v35, %v482_v34 }
 0x2b3   :  { %v513_v40 = vadd.f32 %v512_v36, %v510_v37 }
 0x2b5   :  { %v514_v42 = vadd.f32 %v513_v40, %v511_v39 }
 0x2b7   :  { %v515_v43 = vrot.slane %v514_v42, 4 }
 0x2b9   :  { %v516_v45 = vadd.f32 %v515_v43, %v514_v42 }
 0x2bb   :  { %v517_v46 = vrot.slane %v516_v45, 2 }
 0x2bd   :  { %v518_v48 = vadd.f32 %v517_v46, %v516_v45 }
 0x2bf   :  { %v519_v50 = vrot.slane %v518_v48, 1 }
 0x2c1   :  { %v520_v52 = vadd.f32 %v519_v50, %v518_v48 }
 0x2c3   :  { %v531_v53 = vadd.f32 %v530_v51, %v520_v52 }
 0x2c5   :  { %v532_v54 = vsub.f32 0.0, %v531_v53 }
 0x2c7   :  { %v533_v55 = vmul.f32 1.442695, %v532_v54 }
 0x2c9   :  { %694 = vpow2.f32 %v533_v55 }
 0x2d6   :  { %v695_v56 = vpop.eup %694 }
 0x2d7   :  { %v535_v57 = vadd.f32 1.0, %v695_v56 }
 0x2d9   :  { %696 = vrcp.f32 %v535_v57 }
 0x2e6   :  { %v697_v58 = vpop.eup %696 }
 0x2e7   :  { %537 = vst [vmem:[#allocation3] sm:$0x1] %v697_v58 }
 0x2e8   :  { %709 = shalt.err (!%p706_p4)
}
 0x2e9   :  { %547 = dma.vmem_to_hbm [thread:$0]  %s545_s9, 16, %s951_s7, [#allocation4]  }
 0x2ea   :  { %718 = dma.done.wait [#allocation4], 16  }
 0x2eb   :  { %719 = vsyncadd [#allocation4], 4294967280 }
 0x2ec   :  { %551 = vsyncpa [#allocation4], 1 }

</bundles_post_ra>
